<compile_context>
chip_gen: v7x
topology: tpu7x:2x2x1
jax: 0.10.0
libtpu: 0.0.40
codegen_flags: <defaults>
</compile_context>

<pallas_src>
import numpy as np
import jax
import jax.numpy as jnp
from jax.experimental import pallas as pl
from jax.experimental.pallas import tpu as pltpu


# ----------------------------------------------------------------------------
# Fused kernel: attention pool + channel_add / channel_mul MLPs + fusion
# ----------------------------------------------------------------------------
def make_block2d_kernel(planes):
    p = planes
    eps = 1e-5

    def kernel(x_ref, wm_ref, w1t_ref, v1_ref, w2_ref, b2_ref, o_ref):
        x = x_ref[0]                                   # (C, HW) f32, C on sublanes

        # ---- spatial attention pool ------------------------------------
        # conv_mask (1x1 conv C->1); its bias cancels exactly in the softmax.
        logits = jnp.sum(x * wm_ref[...], axis=0, keepdims=True)          # (1, HW)
        e = jnp.exp(logits - jnp.max(logits, axis=1, keepdims=True))
        attn = e * pl.reciprocal(jnp.sum(e, axis=1, keepdims=True), approx=True)
        ctx = jnp.sum(x * attn, axis=1, keepdims=True)                    # (C, 1)

        # ---- both bottleneck MLPs (channel_add & channel_mul), stacked --
        w1t = w1t_ref[...]                             # (C, 2p)  [add | mul] conv1 weights^T
        v1 = v1_ref[...]                               # (3, 2p)  rows: b1, ln_gamma, ln_beta
        w2 = w2_ref[...]                               # (C, 2p)  [add | mul] conv2 weights
        b2 = b2_ref[...]                               # (C, 2)   cols: b2_add, b2_mul

        # layer 1 (1x1 conv on the pooled context): (1, 2p)
        t = jnp.sum(w1t * ctx, axis=0, keepdims=True) + v1[0:1, :]

        def ln_relu(tt, g, b):                         # LayerNorm over planes + ReLU
            mu = jnp.mean(tt, axis=1, keepdims=True)
            d = tt - mu
            var = jnp.mean(d * d, axis=1, keepdims=True)
            return jnp.maximum(d * jax.lax.rsqrt(var + eps) * g + b, 0.0)

        g, be = v1[1:2, :], v1[2:3, :]
        t_add = ln_relu(t[:, :p], g[:, :p], be[:, :p])                    # (1, p)
        t_mul = ln_relu(t[:, p:], g[:, p:], be[:, p:])                    # (1, p)

        # layer 2 (1x1 conv planes->C), kept as per-channel column vectors
        add_col = jnp.sum(w2[:, :p] * t_add, axis=1, keepdims=True) + b2[:, 0:1]   # (C,1)
        mul_col = jax.nn.sigmoid(
            jnp.sum(w2[:, p:] * t_mul, axis=1, keepdims=True) + b2[:, 1:2])        # (C,1)

        # ---- fuse into the full feature map (single lane-dense store) ---
        o_ref[0] = (x * mul_col + add_col).astype(o_ref.dtype)

    return kernel


def block2d_forward(x, packed, planes):
    """x: (B, C, H, W) f32; packed = (wm, w1t, v1, w2, b2)."""
    B, C, H, W = x.shape
    HW = H * W
    x2 = x.reshape(B, C, HW)                           # free reshape, layout unchanged
    wm, w1t, v1, w2, b2 = packed

    out = pl.pallas_call(
        make_block2d_kernel(planes),
        out_shape=jax.ShapeDtypeStruct((B, C, HW), x.dtype),
        grid=(B,),
        in_specs=[
            pl.BlockSpec((1, C, HW), lambda b: (b, 0, 0)),
            pl.BlockSpec(wm.shape, lambda b: (0, 0)),
            pl.BlockSpec(w1t.shape, lambda b: (0, 0)),
            pl.BlockSpec(v1.shape, lambda b: (0, 0)),
            pl.BlockSpec(w2.shape, lambda b: (0, 0)),
            pl.BlockSpec(b2.shape, lambda b: (0, 0)),
        ],
        out_specs=pl.BlockSpec((1, C, HW), lambda b: (b, 0, 0)),
        compiler_params=pltpu.CompilerParams(dimension_semantics=("parallel",)),
    )(x2, wm, w1t, v1, w2, b2)
    return out.reshape(B, C, H, W)


# ----------------------------------------------------------------------------
# Parameters (same shapes as the nn.Module; random so the test is non-trivial)
# ----------------------------------------------------------------------------
def init_params(key, C):
    p = C // 4
    ks = jax.random.split(key, 14)

    def w(k_, shape, s=0.1):
        return (s * jax.random.normal(k_, shape)).astype(jnp.float32)

    return dict(
        conv_mask_w=w(ks[0], (C,)), conv_mask_b=w(ks[1], ()),
        add_w1=w(ks[2], (p, C)), add_b1=w(ks[3], (p,)),
        add_g=jnp.ones((p,), jnp.float32) + w(ks[4], (p,)), add_beta=w(ks[5], (p,)),
        add_w2=w(ks[6], (C, p)), add_b2=w(ks[7], (C,)),
        mul_w1=w(ks[8], (p, C)), mul_b1=w(ks[9], (p,)),
        mul_g=jnp.ones((p,), jnp.float32) + w(ks[10], (p,)), mul_beta=w(ks[11], (p,)),
        mul_w2=w(ks[12], (C, p)), mul_b2=w(ks[13], (C,)),
    )


def pack_params(raw):
    C = raw["conv_mask_w"].shape[0]
    wm = raw["conv_mask_w"].reshape(C, 1)
    w1t = jnp.concatenate([raw["add_w1"].T, raw["mul_w1"].T], axis=1)      # (C, 2p)
    v1 = jnp.stack([
        jnp.concatenate([raw["add_b1"], raw["mul_b1"]]),
        jnp.concatenate([raw["add_g"], raw["mul_g"]]),
        jnp.concatenate([raw["add_beta"], raw["mul_beta"]]),
    ], axis=0)                                                             # (3, 2p)
    w2 = jnp.concatenate([raw["add_w2"], raw["mul_w2"]], axis=1)           # (C, 2p)
    b2 = jnp.stack([raw["add_b2"], raw["mul_b2"]], axis=1)                 # (C, 2)
    return wm, w1t, v1, w2, b2


# ----------------------------------------------------------------------------
# Pure-JAX reference mirroring the PyTorch forward (includes conv_mask bias)
# ----------------------------------------------------------------------------
def reference(x, raw):
    B, C, H, W = x.shape
    xf = x.reshape(B, C, H * W)
    logits = jnp.einsum('bcs,c->bs', xf, raw["conv_mask_w"]) + raw["conv_mask_b"]
    attn = jax.nn.softmax(logits, axis=-1)                                 # (B, HW)
    ctx = jnp.einsum('bcs,bs->bc', xf, attn)                               # (B, C)

    def mlp(c, w1, b1, g, be, w2, b2, eps=1e-5):
        t = c @ w1.T + b1                                                  # (B, p)
        mu = jnp.mean(t, axis=-1, keepdims=True)
        var = jnp.mean((t - mu) ** 2, axis=-1, keepdims=True)
        t = (t - mu) / jnp.sqrt(var + eps) * g + be
        t = jnp.maximum(t, 0.0)
        return t @ w2.T + b2                                               # (B, C)

    add_term = mlp(ctx, raw["add_w1"], raw["add_b1"], raw["add_g"],
                   raw["add_beta"], raw["add_w2"], raw["add_b2"])
    mul_term = jax.nn.sigmoid(mlp(ctx, raw["mul_w1"], raw["mul_b1"], raw["mul_g"],
                                  raw["mul_beta"], raw["mul_w2"], raw["mul_b2"]))
    return x * mul_term[:, :, None, None] + add_term[:, :, None, None]


if __name__ == "__main__":
    B, C, H, W = 2, 32, 16, 16      # inplanes=32 -> planes=8
    planes = C // 4

    key = jax.random.PRNGKey(0)
    kx, kp = jax.random.split(key)
    x = jax.random.normal(kx, (B, C, H, W), jnp.float32)
    raw = init_params(kp, C)
    packed = pack_params(raw)

    out = block2d_forward(x, packed, planes)
    out = jax.block_until_ready(out)

    ref = reference(x, raw)
    np.testing.assert_allclose(np.asarray(out), np.asarray(ref), rtol=2e-2, atol=2e-2)
    print("KERNEL_OK")
</pallas_src>

<mosaic_0001>
module attributes {stable_mosaic.version = 11 : i64} {
  func.func @kernel(%arg0: i32, %arg1: memref<1x32x256xf32, #tpu.memory_space<vmem>>, %arg2: memref<32x1xf32, #tpu.memory_space<vmem>>, %arg3: memref<32x16xf32, #tpu.memory_space<vmem>>, %arg4: memref<3x16xf32, #tpu.memory_space<vmem>>, %arg5: memref<32x16xf32, #tpu.memory_space<vmem>>, %arg6: memref<32x2xf32, #tpu.memory_space<vmem>>, %arg7: memref<1x32x256xf32, #tpu.memory_space<vmem>>) attributes {dimension_semantics = [#tpu.dimension_semantics<parallel>], iteration_bounds = array<i64: 2>, scalar_prefetch = 0 : i64, scratch_operands = 0 : i64, tpu.core_type = #tpu.core_type<tc>, window_params = [{transform_indices = @transform_0, window_bounds = array<i64: 1, 32, 256>}, {pipeline_mode = #tpu.pipeline_mode<synchronous>, transform_indices = @transform_1, window_bounds = array<i64: 32, 1>}, {pipeline_mode = #tpu.pipeline_mode<synchronous>, transform_indices = @transform_2, window_bounds = array<i64: 32, 16>}, {pipeline_mode = #tpu.pipeline_mode<synchronous>, transform_indices = @transform_3, window_bounds = array<i64: 3, 16>}, {pipeline_mode = #tpu.pipeline_mode<synchronous>, transform_indices = @transform_4, window_bounds = array<i64: 32, 16>}, {pipeline_mode = #tpu.pipeline_mode<synchronous>, transform_indices = @transform_5, window_bounds = array<i64: 32, 2>}, {transform_indices = @transform_6, window_bounds = array<i64: 1, 32, 256>}]} {
    %c0 = arith.constant 0 : index
    %c0_0 = arith.constant 0 : index
    %c0_1 = arith.constant 0 : index
    %0 = vector.load %arg1[%c0, %c0_0, %c0_1] : memref<1x32x256xf32, #tpu.memory_space<vmem>>, vector<1x32x256xf32>
    %1 = vector.shape_cast %0 : vector<1x32x256xf32> to vector<32x256xf32>
    %c0_2 = arith.constant 0 : index
    %c0_3 = arith.constant 0 : index
    %2 = vector.load %arg2[%c0_2, %c0_3] : memref<32x1xf32, #tpu.memory_space<vmem>>, vector<32x1xf32>
    %3 = vector.broadcast %2 : vector<32x1xf32> to vector<32x256xf32>
    %4 = arith.mulf %1, %3 : vector<32x256xf32>
    %cst = arith.constant dense<0.000000e+00> : vector<256xf32>
    %5 = vector.multi_reduction <add>, %4, %cst [0] : vector<32x256xf32> to vector<256xf32>
    %6 = vector.shape_cast %5 : vector<256xf32> to vector<1x256xf32>
    %cst_4 = arith.constant dense<0xFF800000> : vector<1xf32>
    %7 = vector.multi_reduction <maximumf>, %6, %cst_4 [1] : vector<1x256xf32> to vector<1xf32>
    %8 = vector.shape_cast %7 : vector<1xf32> to vector<1x1xf32>
    %9 = vector.broadcast %8 : vector<1x1xf32> to vector<1x256xf32>
    %10 = arith.subf %6, %9 : vector<1x256xf32>
    %11 = math.exp %10 : vector<1x256xf32>
    %cst_5 = arith.constant dense<0.000000e+00> : vector<1xf32>
    %12 = vector.multi_reduction <add>, %11, %cst_5 [1] : vector<1x256xf32> to vector<1xf32>
    %13 = vector.shape_cast %12 : vector<1xf32> to vector<1x1xf32>
    %14 = tpu.reciprocal %13 {approx = true} : vector<1x1xf32> -> vector<1x1xf32>
    %15 = vector.broadcast %14 : vector<1x1xf32> to vector<1x256xf32>
    %16 = arith.mulf %11, %15 : vector<1x256xf32>
    %17 = vector.broadcast %16 : vector<1x256xf32> to vector<32x256xf32>
    %18 = arith.mulf %1, %17 : vector<32x256xf32>
    %cst_6 = arith.constant dense<0.000000e+00> : vector<32xf32>
    %19 = vector.multi_reduction <add>, %18, %cst_6 [1] : vector<32x256xf32> to vector<32xf32>
    %20 = vector.shape_cast %19 : vector<32xf32> to vector<32x1xf32>
    %c0_7 = arith.constant 0 : index
    %c0_8 = arith.constant 0 : index
    %21 = vector.load %arg3[%c0_7, %c0_8] : memref<32x16xf32, #tpu.memory_space<vmem>>, vector<32x16xf32>
    %c0_9 = arith.constant 0 : index
    %c0_10 = arith.constant 0 : index
    %22 = vector.load %arg4[%c0_9, %c0_10] : memref<3x16xf32, #tpu.memory_space<vmem>>, vector<3x16xf32>
    %c0_11 = arith.constant 0 : index
    %c0_12 = arith.constant 0 : index
    %23 = vector.load %arg5[%c0_11, %c0_12] : memref<32x16xf32, #tpu.memory_space<vmem>>, vector<32x16xf32>
    %c0_13 = arith.constant 0 : index
    %c0_14 = arith.constant 0 : index
    %24 = vector.load %arg6[%c0_13, %c0_14] : memref<32x2xf32, #tpu.memory_space<vmem>>, vector<32x2xf32>
    %25 = vector.broadcast %20 : vector<32x1xf32> to vector<32x16xf32>
    %26 = arith.mulf %21, %25 : vector<32x16xf32>
    %cst_15 = arith.constant dense<0.000000e+00> : vector<16xf32>
    %27 = vector.multi_reduction <add>, %26, %cst_15 [0] : vector<32x16xf32> to vector<16xf32>
    %28 = vector.shape_cast %27 : vector<16xf32> to vector<1x16xf32>
    %29 = vector.extract_strided_slice %22 {offsets = [0, 0], sizes = [1, 16], strides = [1, 1]} : vector<3x16xf32> to vector<1x16xf32>
    %30 = arith.addf %28, %29 : vector<1x16xf32>
    %31 = vector.extract_strided_slice %22 {offsets = [1, 0], sizes = [1, 16], strides = [1, 1]} : vector<3x16xf32> to vector<1x16xf32>
    %32 = vector.extract_strided_slice %22 {offsets = [2, 0], sizes = [1, 16], strides = [1, 1]} : vector<3x16xf32> to vector<1x16xf32>
    %33 = vector.extract_strided_slice %30 {offsets = [0, 0], sizes = [1, 8], strides = [1, 1]} : vector<1x16xf32> to vector<1x8xf32>
    %34 = vector.extract_strided_slice %31 {offsets = [0, 0], sizes = [1, 8], strides = [1, 1]} : vector<1x16xf32> to vector<1x8xf32>
    %35 = vector.extract_strided_slice %32 {offsets = [0, 0], sizes = [1, 8], strides = [1, 1]} : vector<1x16xf32> to vector<1x8xf32>
    %cst_16 = arith.constant dense<0.000000e+00> : vector<1xf32>
    %36 = vector.multi_reduction <add>, %33, %cst_16 [1] : vector<1x8xf32> to vector<1xf32>
    %37 = vector.shape_cast %36 : vector<1xf32> to vector<1x1xf32>
    %cst_17 = arith.constant 8.000000e+00 : f32
    %38 = vector.broadcast %cst_17 : f32 to vector<1x1xf32>
    %39 = arith.divf %37, %38 : vector<1x1xf32>
    %40 = vector.broadcast %39 : vector<1x1xf32> to vector<1x8xf32>
    %41 = arith.subf %33, %40 : vector<1x8xf32>
    %42 = arith.mulf %41, %41 : vector<1x8xf32>
    %cst_18 = arith.constant dense<0.000000e+00> : vector<1xf32>
    %43 = vector.multi_reduction <add>, %42, %cst_18 [1] : vector<1x8xf32> to vector<1xf32>
    %44 = vector.shape_cast %43 : vector<1xf32> to vector<1x1xf32>
    %cst_19 = arith.constant 8.000000e+00 : f32
    %45 = vector.broadcast %cst_19 : f32 to vector<1x1xf32>
    %46 = arith.divf %44, %45 : vector<1x1xf32>
    %cst_20 = arith.constant 9.99999974E-6 : f32
    %47 = vector.broadcast %cst_20 : f32 to vector<1x1xf32>
    %48 = arith.addf %46, %47 : vector<1x1xf32>
    %49 = math.rsqrt %48 : vector<1x1xf32>
    %50 = vector.broadcast %49 : vector<1x1xf32> to vector<1x8xf32>
    %51 = arith.mulf %41, %50 : vector<1x8xf32>
    %52 = arith.mulf %51, %34 : vector<1x8xf32>
    %53 = arith.addf %52, %35 : vector<1x8xf32>
    %cst_21 = arith.constant 0.000000e+00 : f32
    %54 = vector.broadcast %cst_21 : f32 to vector<1x8xf32>
    %55 = arith.maximumf %53, %54 : vector<1x8xf32>
    %56 = vector.extract_strided_slice %30 {offsets = [0, 8], sizes = [1, 8], strides = [1, 1]} : vector<1x16xf32> to vector<1x8xf32>
    %57 = vector.extract_strided_slice %31 {offsets = [0, 8], sizes = [1, 8], strides = [1, 1]} : vector<1x16xf32> to vector<1x8xf32>
    %58 = vector.extract_strided_slice %32 {offsets = [0, 8], sizes = [1, 8], strides = [1, 1]} : vector<1x16xf32> to vector<1x8xf32>
    %cst_22 = arith.constant dense<0.000000e+00> : vector<1xf32>
    %59 = vector.multi_reduction <add>, %56, %cst_22 [1] : vector<1x8xf32> to vector<1xf32>
    %60 = vector.shape_cast %59 : vector<1xf32> to vector<1x1xf32>
    %cst_23 = arith.constant 8.000000e+00 : f32
    %61 = vector.broadcast %cst_23 : f32 to vector<1x1xf32>
    %62 = arith.divf %60, %61 : vector<1x1xf32>
    %63 = vector.broadcast %62 : vector<1x1xf32> to vector<1x8xf32>
    %64 = arith.subf %56, %63 : vector<1x8xf32>
    %65 = arith.mulf %64, %64 : vector<1x8xf32>
    %cst_24 = arith.constant dense<0.000000e+00> : vector<1xf32>
    %66 = vector.multi_reduction <add>, %65, %cst_24 [1] : vector<1x8xf32> to vector<1xf32>
    %67 = vector.shape_cast %66 : vector<1xf32> to vector<1x1xf32>
    %cst_25 = arith.constant 8.000000e+00 : f32
    %68 = vector.broadcast %cst_25 : f32 to vector<1x1xf32>
    %69 = arith.divf %67, %68 : vector<1x1xf32>
    %cst_26 = arith.constant 9.99999974E-6 : f32
    %70 = vector.broadcast %cst_26 : f32 to vector<1x1xf32>
    %71 = arith.addf %69, %70 : vector<1x1xf32>
    %72 = math.rsqrt %71 : vector<1x1xf32>
    %73 = vector.broadcast %72 : vector<1x1xf32> to vector<1x8xf32>
    %74 = arith.mulf %64, %73 : vector<1x8xf32>
    %75 = arith.mulf %74, %57 : vector<1x8xf32>
    %76 = arith.addf %75, %58 : vector<1x8xf32>
    %cst_27 = arith.constant 0.000000e+00 : f32
    %77 = vector.broadcast %cst_27 : f32 to vector<1x8xf32>
    %78 = arith.maximumf %76, %77 : vector<1x8xf32>
    %79 = vector.extract_strided_slice %23 {offsets = [0, 0], sizes = [32, 8], strides = [1, 1]} : vector<32x16xf32> to vector<32x8xf32>
    %80 = vector.broadcast %55 : vector<1x8xf32> to vector<32x8xf32>
    %81 = arith.mulf %79, %80 : vector<32x8xf32>
    %cst_28 = arith.constant dense<0.000000e+00> : vector<32xf32>
    %82 = vector.multi_reduction <add>, %81, %cst_28 [1] : vector<32x8xf32> to vector<32xf32>
    %83 = vector.shape_cast %82 : vector<32xf32> to vector<32x1xf32>
    %84 = vector.extract_strided_slice %24 {offsets = [0, 0], sizes = [32, 1], strides = [1, 1]} : vector<32x2xf32> to vector<32x1xf32>
    %85 = arith.addf %83, %84 : vector<32x1xf32>
    %86 = vector.extract_strided_slice %23 {offsets = [0, 8], sizes = [32, 8], strides = [1, 1]} : vector<32x16xf32> to vector<32x8xf32>
    %87 = vector.broadcast %78 : vector<1x8xf32> to vector<32x8xf32>
    %88 = arith.mulf %86, %87 : vector<32x8xf32>
    %cst_29 = arith.constant dense<0.000000e+00> : vector<32xf32>
    %89 = vector.multi_reduction <add>, %88, %cst_29 [1] : vector<32x8xf32> to vector<32xf32>
    %90 = vector.shape_cast %89 : vector<32xf32> to vector<32x1xf32>
    %91 = vector.extract_strided_slice %24 {offsets = [0, 1], sizes = [32, 1], strides = [1, 1]} : vector<32x2xf32> to vector<32x1xf32>
    %92 = arith.addf %90, %91 : vector<32x1xf32>
    %93 = arith.negf %92 : vector<32x1xf32>
    %94 = math.exp %93 : vector<32x1xf32>
    %cst_30 = arith.constant 1.000000e+00 : f32
    %95 = vector.broadcast %cst_30 : f32 to vector<32x1xf32>
    %96 = arith.addf %95, %94 : vector<32x1xf32>
    %97 = arith.divf %95, %96 : vector<32x1xf32>
    %98 = vector.broadcast %97 : vector<32x1xf32> to vector<32x256xf32>
    %99 = arith.mulf %1, %98 : vector<32x256xf32>
    %100 = vector.broadcast %85 : vector<32x1xf32> to vector<32x256xf32>
    %101 = arith.addf %99, %100 : vector<32x256xf32>
    %c0_31 = arith.constant 0 : index
    %c0_32 = arith.constant 0 : index
    %c0_33 = arith.constant 0 : index
    %102 = vector.load %arg7[%c0_31, %c0_32, %c0_33] : memref<1x32x256xf32, #tpu.memory_space<vmem>>, vector<1x32x256xf32>
    %103 = vector.shape_cast %102 : vector<1x32x256xf32> to vector<32x256xf32>
    %104 = vector.shape_cast %101 : vector<32x256xf32> to vector<1x32x256xf32>
    tpu.vector_store %arg7[%c0_31, %c0_32, %c0_33], %104 {strides = array<i32>} : memref<1x32x256xf32, #tpu.memory_space<vmem>>, vector<1x32x256xf32>,
    return
  }
  func.func @transform_0(%arg0: i32) -> (i32, i32, i32) {
    %c0_i32 = arith.constant 0 : i32
    %c0_i32_0 = arith.constant 0 : i32
    %c0_i32_1 = arith.constant 0 : i32
    return %arg0, %c0_i32, %c0_i32_0 : i32, i32, i32
  }
  func.func @transform_1(%arg0: i32) -> (i32, i32) {
    %c0_i32 = arith.constant 0 : i32
    %c0_i32_0 = arith.constant 0 : i32
    %c0_i32_1 = arith.constant 0 : i32
    return %c0_i32, %c0_i32_0 : i32, i32
  }
  func.func @transform_2(%arg0: i32) -> (i32, i32) {
    %c0_i32 = arith.constant 0 : i32
    %c0_i32_0 = arith.constant 0 : i32
    %c0_i32_1 = arith.constant 0 : i32
    return %c0_i32, %c0_i32_0 : i32, i32
  }
  func.func @transform_3(%arg0: i32) -> (i32, i32) {
    %c0_i32 = arith.constant 0 : i32
    %c0_i32_0 = arith.constant 0 : i32
    %c0_i32_1 = arith.constant 0 : i32
    return %c0_i32, %c0_i32_0 : i32, i32
  }
  func.func @transform_4(%arg0: i32) -> (i32, i32) {
    %c0_i32 = arith.constant 0 : i32
    %c0_i32_0 = arith.constant 0 : i32
    %c0_i32_1 = arith.constant 0 : i32
    return %c0_i32, %c0_i32_0 : i32, i32
  }
  func.func @transform_5(%arg0: i32) -> (i32, i32) {
    %c0_i32 = arith.constant 0 : i32
    %c0_i32_0 = arith.constant 0 : i32
    %c0_i32_1 = arith.constant 0 : i32
    return %c0_i32, %c0_i32_0 : i32, i32
  }
  func.func @transform_6(%arg0: i32) -> (i32, i32, i32) {
    %c0_i32 = arith.constant 0 : i32
    %c0_i32_0 = arith.constant 0 : i32
    %c0_i32_1 = arith.constant 0 : i32
    return %arg0, %c0_i32, %c0_i32_0 : i32, i32, i32
  }
}

</mosaic_0001>

<bundles_post_ra>
// kernel: tpu_custom_call.1
= control target key start
LH: loop header
LB: loop body
LE: loop exit
PB: predicated region body
PF: predicated region fallthrough
CT: control target
= control target key end

     0   :  { %11 = vsyncpa [#allocation3], 0  ;;  %s1073_s0 = inlined_call_operand.vmem [shape: f32[2,32,256], index: 0, kind: input, shape index: {}]   ;;  %s1074_s1 = inlined_call_operand.vmem [shape: f32[32,1], index: 1, kind: input, shape index: {}]   ;;  %s1075_s2 = inlined_call_operand.vmem [shape: f32[32,16], index: 2, kind: input, shape index: {}]   ;;  %s1076_s3 = inlined_call_operand.vmem [shape: f32[3,16], index: 3, kind: input, shape index: {}]   ;;  %s1077_s4 = inlined_call_operand.vmem [shape: f32[32,16], index: 4, kind: input, shape index: {}]   ;;  %s1078_s5 = inlined_call_operand.vmem [shape: f32[32,2], index: 5, kind: input, shape index: {}]   ;;  %s1079_s6 = inlined_call_operand.hbm [shape: f32[2,32,256], index: 6, kind: output, shape index: {}]  }
   0x1   :  { %13 = vsyncpa [#allocation3 + $0x1], 0  ;;  %s852_s21 = smov 0   ;;  %s854_s22 = smov 0  }
   0x2   :  { %s856_s23 = smov 0   ;;  %s858_s24 = smov 0  }
   0x3 LB: > { %s873_s25 = sadd.s32 4294967295, %s809_s24   ;;  %s651_s26 = sadd.s32 4294967294, %s809_s24   ;;  %s809_s24 = sphi %s858_s24, %s1085_s24   ;;  %s805_s23 = sphi %s856_s23, %s1084_s23   ;;  %s801_s22 = sphi %s854_s22, %s1083_s22   ;;  %s797_s21 = sphi %s852_s21, %s1082_s21  }
   0x4   : > { %s877_s27 = sadd.s32 1, %s809_s24   ;;  %s157_s28 = sadd.s32 1, %s805_s23 }
   0x5   : > { %s154_s29 = ssub.s32 %s809_s24, %s877_s27  ;;  %p167_p0 = scmp.ne.s32.totalorder %s805_s23, %s801_s22 }
   0x6   : > { %p155_p1 = scmp.eq.s32.totalorder %s154_s29, 0  ;;  %p168_p2 = scmp.eq.s32.totalorder %s873_s25, 1 }
   0x7   : > { %p173_p3 = scmp.ne.s32.totalorder %s801_s22, %s797_s21  ;;  %p174_p4 = scmp.eq.s32.totalorder %s651_s26, 1 }
   0x8   : > { %s888_s30 = scalar_select %p155_p1, %s805_s23, %s157_s28  }
   0x9   : > { %p890_p5 = por %p168_p2, %p167_p0  ;;  %p894_p6 = por %p174_p4, %p173_p3 }
   0xa   : > { %p654_p7 = scmp.ge.s32.totalorder %s809_s24, 1  ;;  %p215_p8 = scmp.lt.s32.totalorder %s809_s24, 3 }
   0xc   : > { %p216_p9 = pnand %p654_p7, %p215_p8 }
   0xd   : > { %v260_v0 = vld [vmem:[%s1074_s1 + $0x10] sm:$0xff] (!%p216_p9)  ;;  %v258_v1 = vld [vmem:[%s1074_s1] sm:$0xff] (!%p216_p9)  ;;  %v811_v2 = vmov (!%p216_p9), 0   ;;  %v261_v3 = vld [vmem:[%s1074_s1 + $0x18] sm:$0xff] (!%p216_p9)  ;;  %p245_p10 = scmp.lt.s32.totalorder (!%p216_p9), %s873_s25, 1  ;;  %vm360_vm0 = vcmask (!%p216_p9), 130048  }
   0xe   : > { %219 = sbr.rel (%p216_p9) target bundleno = 1665 (0x681), region = 44  ;;  %714 = vset.pattern.permute.xlu1 (!%p216_p9), %v811_v2  ;;  %713 = vset.pattern.permute.xlu0 (!%p216_p9), %v811_v2  ;;  %v259_v4 = vld [vmem:[%s1074_s1 + $0x8] sm:$0xff] (!%p216_p9)  ;;  %vm375_vm1 = vcmask (!%p216_p9), 57344   ;;  %vm430_vm2 = vcmask (!%p216_p9), 64512   ;;  %s242_s19 = sand.u32 (!%p216_p9), 1, %s801_s22  }
   0xf   : > { %274 = vperm.xlu1 (!%p216_p9), %714, %v260_v0   ;;  %264 = vperm.xlu0 (!%p216_p9), %713, %v258_v1   ;;  %s655_s20 = sshll.u32 (!%p216_p9), %s242_s19, 6  ;;  %s668_s28 = sshll.u32 (!%p216_p9), %s873_s25, 10 }
  0x10   : > { %s1026_s11 = scalar_lea.hbm (!%p216_p9), %s1079_s6, %s668_s28  ;;  %s814_s13 = smov (!%p216_p9), [#allocation2]  }
  0x11   : > { %s751_s14 = sshll.u32 (!%p216_p9), %s814_s13, 4  ;;  %s752_s14 = int_to_ptr.vmem [resolvable:$false] %s751_s14 }
  0x12   : > { %s753_s15 = scalar_lea.vmem (!%p216_p9), %s752_s14, 2048 }
  0x13   : > { %279 = vperm.xlu1 (!%p216_p9), %714, %v261_v3   ;;  %269 = vperm.xlu0 (!%p216_p9), %713, %v259_v4  }
  0x15   : > { %s246_s17 = scalar_select %p245_p10, %s873_s25, 1 }
  0x16   : > { %s1032_s25 = scalar_lea.sflag [#allocation3], %s242_s19 }
  0x17   : > { %s667_s18 = sshll.u32 %s246_s17, 6  ;;  %s812_s17 = smov 120  }
  0x18   : > { %s249_s26 = scalar_lea.vmem %s1073_s0, %s667_s18 }
  0x19   : > { %v919_v7 = vld [vmem:[%s249_s26] sm:$0xff]  ;;  %v921_v8 = vld [vmem:[%s249_s26 + $0x8] sm:$0xff]  ;;  %v923_v9 = vld [vmem:[%s249_s26 + $0x10] sm:$0xff] }
  0x1a   : > { %v925_v10 = vld [vmem:[%s249_s26 + $0x18] sm:$0xff]  ;;  %v927_v11 = vld [vmem:[%s249_s26 + $0x20] sm:$0xff]  ;;  %v929_v12 = vld [vmem:[%s249_s26 + $0x28] sm:$0xff] }
  0x1b   : > { %v935_v19 = vld [vmem:[%s249_s26 + $0x30] sm:$0xff]  ;;  %v937_v20 = vld [vmem:[%s249_s26 + $0x38] sm:$0xff]  ;;  %s244_s26 = scalar_lea.vmem [#allocation2], %s655_s20 }
  0x1c   : > { %s589_s29 = sshll.u32 %s244_s26, 4  ;;  %s1028_s29 = int_to_ptr.vmem [resolvable:$true] %s589_s29 }
  0x1d   : > { %s747_s12 = scalar_lea.vmem %s1028_s29, 1024  ;;  %p754_p0 = scmp.lt.s32.totalorder %s1028_s29, %s752_s14 }
  0x1e   : > { %p748_p11 = scmp.ne.s32.totalorder %s1028_s29, %s747_s12  ;;  %p755_p1 = scmp.lt.s32.totalorder %s753_s15, %s747_s12 }
  0x20   : > { %p749_p12 = pnand %p748_p11, %p890_p5  ;;  %p756_p2 = por %p755_p1, %p754_p0 }
  0x22   : > { %p750_p13 = pneg %p749_p12 }
  0x24   : > { %p757_p3 = pnand %p756_p2, %p750_p13 }
  0x8e   : > { %v275_v5 = vpop.permute.xlu1 %274  ;;  %v265_v6 = vpop.permute.xlu0 %264 }
  0x8f   : > { %v282_v14 = vmul.f32 %v265_v6, %v919_v7  ;;  %v283_v15 = vmul.f32 %v265_v6, %v921_v8  ;;  %v286_v21 = vmul.f32 %v275_v5, %v927_v11  ;;  %v287_v22 = vmul.f32 %v275_v5, %v929_v12  ;;  %v343_v5 = vld [vmem:[%s1075_s2] sm:$0xff] }
  0x92   : > { %v270_v13 = vpop.permute.xlu0 %269  ;;  %v280_v18 = vpop.permute.xlu1 %279 }
  0x93   : > { %v284_v16 = vmul.f32 %v270_v13, %v923_v9  ;;  %v285_v17 = vmul.f32 %v270_v13, %v925_v10  ;;  %v288_v25 = vmul.f32 %v280_v18, %v935_v19  ;;  %v289_v26 = vmul.f32 %v280_v18, %v937_v20  ;;  %v345_v13 = vld [vmem:[%s1075_s2 + $0x10] sm:$0xff] }
  0x95   : > { %v290_v23 = vadd.f32 %v284_v16, %v282_v14  ;;  %v299_v24 = vadd.f32 %v285_v17, %v283_v15  ;;  %v344_v15 = vld [vmem:[%s1075_s2 + $0x8] sm:$0xff] }
  0x97   : > { %v291_v27 = vadd.f32 %v290_v23, %v286_v21  ;;  %v300_v28 = vadd.f32 %v299_v24, %v287_v22  ;;  %v346_v22 = vld [vmem:[%s1075_s2 + $0x18] sm:$0xff] }
  0x99   : > { %v292_v29 = vadd.f32 %v291_v27, %v288_v25  ;;  %v301_v30 = vadd.f32 %v300_v28, %v289_v26 }
  0x9b   : > { %v293_v31 = vrot.slane %v292_v29, 4  ;;  %v302_v32 = vrot.slane %v301_v30, 4 }
  0x9d   : > { %v294_v33 = vadd.f32 %v293_v31, %v292_v29  ;;  %v303_v34 = vadd.f32 %v302_v32, %v301_v30 }
  0x9f   : > { %v295_v35 = vrot.slane %v294_v33, 2  ;;  %v304_v36 = vrot.slane %v303_v34, 2 }
  0xa1   : > { %v296_v37 = vadd.f32 %v295_v35, %v294_v33  ;;  %v305_v38 = vadd.f32 %v304_v36, %v303_v34 }
  0xa3   : > { %v297_v39 = vrot.slane %v296_v37, 1  ;;  %v306_v40 = vrot.slane %v305_v38, 1 }
  0xa5   : > { %v298_v41 = vadd.f32 %v297_v39, %v296_v37  ;;  %v307_v42 = vadd.f32 %v306_v40, %v305_v38  ;;  %v347_v37 = vld [vmem:[%s1076_s3] sm:$0x7] }
  0xa7   : > { %v308_v43 = vmax.f32 %v298_v41, %v307_v42 }
  0xa9   : > { %309 = vmax.xlane.f32.xlu0 %v308_v43 }
 0x136   : > { %v310_v44 = vpop.xlane.xlu0 %309 }
 0x137   : > { %v311_v45 = vsub.f32 %v298_v41, %v310_v44  ;;  %v312_v46 = vsub.f32 %v307_v42, %v310_v44 }
 0x139   : > { %v313_v47 = vmul.f32 1.442695, %v311_v45  ;;  %v315_v48 = vmul.f32 1.442695, %v312_v46 }
 0x13b   : > { %721 = vpow2.f32 %v313_v47 }
 0x13c   : > { %723 = vpow2.f32 %v315_v48 }
 0x145   : > { %v722_v49 = vpop.eup %721 }
 0x146   : > { %v724_v50 = vpop.eup %723 }
 0x147   : > { %v317_v51 = vadd.f32 %v724_v50, %v722_v49 }
 0x149   : > { %318 = vadd.xlane.f32.xlu1 %v317_v51 }
 0x1d6   : > { %v319_v52 = vpop.xlane.xlu1 %318 }
 0x1d7   : > { %725 = vrcp.f32 %v319_v52 }
 0x1e1   : > { %v726_v53 = vpop.eup %725 }
 0x1e2   : > { %v321_v54 = vmul.f32 %v726_v53, %v722_v49  ;;  %v322_v55 = vmul.f32 %v726_v53, %v724_v50 }
 0x1e4   : > { %v327_v56 = vmul.f32 %v321_v54, %v927_v11  ;;  %v328_v57 = vmul.f32 %v322_v55, %v929_v12  ;;  %v323_v58 = vmul.f32 %v321_v54, %v919_v7  ;;  %v324_v59 = vmul.f32 %v322_v55, %v921_v8 }
 0x1e5   : > { %v325_v62 = vmul.f32 %v321_v54, %v923_v9  ;;  %v326_v63 = vmul.f32 %v322_v55, %v925_v10  ;;  %v329_v1 = vmul.f32 %v321_v54, %v935_v19  ;;  %v330_v3 = vmul.f32 %v322_v55, %v937_v20 }
 0x1e6   : > { %v337_v60 = vadd.f32 %v328_v57, %v327_v56  ;;  %v331_v61 = vadd.f32 %v324_v59, %v323_v58  ;;  %v422_v57 = vlaneseq  ;;  %v391_v58 = vrot.slane %v347_v37, 1 }
 0x1e7   : > { %v334_v0 = vadd.f32 %v326_v63, %v325_v62  ;;  %v340_v4 = vadd.f32 %v330_v3, %v329_v1 }
 0x1e8   : > { %338 = vadd.xlane.f32.xlu1 %v337_v60  ;;  %332 = vadd.xlane.f32.xlu0 %v331_v61  ;;  %v394_v60 = vrot.slane %v347_v37, 2  ;;  %v423_v62 = vshrl.u32 %v422_v57, 7 }
 0x1ea   : > { %v424_v1 = vsub.s32 0, %v423_v62 }
 0x1ec   : > { %335 = vadd.xlane.f32.xlu0 %v334_v0 }
 0x1f0   : > { %341 = vadd.xlane.f32.xlu0 %v340_v4  ;;  %v349_v4 = vld [vmem:[%s1077_s4 + $0x8] sm:$0xff] }
 0x275   : > { %v333_v6 = vpop.xlane.xlu0 %332  ;;  %v339_v14 = vpop.xlane.xlu1 %338 }
 0x276   : > { %v356_v16 = vmul.f32 %v343_v5, %v333_v6  ;;  %v358_v18 = vmul.f32 %v345_v13, %v339_v14  ;;  %v348_v5 = vld [vmem:[%s1077_s4] sm:$0xff] }
 0x278   : > { %v361_v23 = vsel %vm360_vm0, %v356_v16, 0.0  ;;  %v364_v27 = vsel %vm360_vm0, %v358_v18, 0.0 }
 0x279   : > { %v336_v17 = vpop.xlane.xlu0 %335 }
 0x27a   : > { %v357_v21 = vmul.f32 %v344_v15, %v336_v17  ;;  %v350_v15 = vld [vmem:[%s1077_s4 + $0x10] sm:$0xff]  ;;  %v351_v17 = vld [vmem:[%s1077_s4 + $0x18] sm:$0xff] }
 0x27c   : > { %v362_v24 = vsel %vm360_vm0, %v357_v21, 0.0 }
 0x27d   : > { %v363_v25 = vadd.f32 %v362_v24, %v361_v23  ;;  %v342_v26 = vpop.xlane.xlu0 %341 }
 0x27e   : > { %v359_v28 = vmul.f32 %v346_v22, %v342_v26 }
 0x27f   : > { %v365_v29 = vadd.f32 %v364_v27, %v363_v25 }
 0x280   : > { %v366_v30 = vsel %vm360_vm0, %v359_v28, 0.0 }
 0x281   : > { %v367_v31 = vadd.f32 %v366_v30, %v365_v29 }
 0x283   : > { %v368_v32 = vrot.slane %v367_v31, 4 }
 0x285   : > { %v369_v33 = vadd.f32 %v368_v32, %v367_v31 }
 0x287   : > { %v370_v34 = vrot.slane %v369_v33, 2 }
 0x289   : > { %v371_v35 = vadd.f32 %v370_v34, %v369_v33 }
 0x28b   : > { %v372_v36 = vrot.slane %v371_v35, 1 }
 0x28d   : > { %v373_v38 = vadd.f32 %v372_v36, %v371_v35 }
 0x28f   : > { %v374_v39 = vadd.f32 %v373_v38, %v347_v37 }
 0x291   : > { %399 = vrot.lane.b32.xlu1 %v374_v39, %s812_s17  ;;  %v376_v46 = vsel %vm375_vm1, %v374_v39, 0.0 }
 0x303   : > { %v400_v40 = vpop.permute.xlu1 %399 }
 0x304   : > { %v402_v41 = vsel %vm375_vm1, %v400_v40, 0.0 }
 0x305   : > { %403 = vadd.xlane.f32.xlu0 %v402_v41 }
 0x392   : > { %v404_v42 = vpop.xlane.xlu0 %403 }
 0x393   : > { %v405_v43 = vmul.f32 0.125, %v404_v42 }
 0x395   : > { %v406_v44 = vsub.f32 %v374_v39, %v405_v43 }
 0x397   : > { %v407_v45 = vmul.f32 %v406_v44, %v406_v44 }
 0x399   : > { %409 = vrot.lane.b32.xlu0 %v407_v45, %s812_s17 }
 0x3b8   : > { %377 = vadd.xlane.f32.xlu0 %v376_v46  ;;  %v813_v46 = vmov 1  }
 0x3b9   : > { %715 = vset.pattern.permute.xlu1 %v813_v46  ;;  %716 = vset.pattern.permute.xlu0 %v813_v46 }
 0x40b   : > { %v410_v47 = vpop.permute.xlu0 %409 }
 0x40c   : > { %v412_v48 = vsel %vm375_vm1, %v410_v47, 0.0  ;;  %v353_v47 = vld [vmem:[%s1078_s5 + $0x8] sm:$0xff] }
 0x40d   : > { %413 = vadd.xlane.f32.xlu1 %v412_v48  ;;  %v352_v48 = vld [vmem:[%s1078_s5] sm:$0xff] }
 0x445   : > { %v378_v49 = vpop.xlane.xlu0 %377 }
 0x446   : > { %v380_v50 = vmul.f32 0.125, %v378_v49 }
 0x448   : > { %v381_v51 = vsub.f32 %v374_v39, %v380_v50 }
 0x44a   : > { %v382_v52 = vmul.f32 %v381_v51, %v381_v51 }
 0x44c   : > { %v383_v53 = vsel %vm375_vm1, %v382_v52, 0.0 }
 0x44d   : > { %384 = vadd.xlane.f32.xlu1 %v383_v53 }
 0x49a   : > { %v414_v54 = vpop.xlane.xlu1 %413 }
 0x49b   : > { %v415_v55 = vmul.f32 0.125, %v414_v54 }
 0x49d   : > { %v416_v56 = vadd.f32 1e-05, %v415_v55 }
 0x49f   : > { %727 = vrsqrt.f32 %v416_v56  ;;  %v354_v56 = vld [vmem:[%s1078_s5 + $0x10] sm:$0xff] }
 0x4a9   : > { %v728_v59 = vpop.eup %727 }
 0x4aa   : > { %v418_v61 = vmul.f32 %v728_v59, %v406_v44 }
 0x4ac   : > { %v419_v63 = vmul.f32 %v418_v61, %v391_v58 }
 0x4ae   : > { %v420_v0 = vadd.f32 %v419_v63, %v394_v60 }
 0x4b0   : > { %v421_v3 = vmax.f32 %v420_v0, 0.0 }
 0x4b2   : > { %v450_v6 = vrot.slane %v421_v3, %v424_v1 }
 0x4b4   : > { %v452_v13 = vmul.f32 %v450_v6, %v349_v4  ;;  %v451_v14 = vmul.f32 %v450_v6, %v348_v5  ;;  %v453_v16 = vmul.f32 %v450_v6, %v350_v15  ;;  %v454_v18 = vmul.f32 %v450_v6, %v351_v17 }
 0x4b6   : > { %461 = vrot.lane.b32.xlu0 %v452_v13, %s812_s17  ;;  %459 = vrot.lane.b32.xlu1 %v451_v14, %s812_s17 }
 0x4ba   : > { %463 = vrot.lane.b32.xlu1 %v453_v16, %s812_s17 }
 0x4be   : > { %465 = vrot.lane.b32.xlu1 %v454_v18, %s812_s17 }
 0x4da   : > { %v385_v21 = vpop.xlane.xlu1 %384 }
 0x4db   : > { %v386_v22 = vmul.f32 0.125, %v385_v21 }
 0x4dd   : > { %v387_v23 = vadd.f32 1e-05, %v386_v22 }
 0x4df   : > { %729 = vrsqrt.f32 %v387_v23 }
 0x4e9   : > { %v730_v24 = vpop.eup %729 }
 0x4ea   : > { %v389_v25 = vmul.f32 %v730_v24, %v381_v51 }
 0x4ec   : > { %v393_v26 = vmul.f32 %v391_v58, %v389_v25  ;;  %v355_v58 = vld [vmem:[%s1078_s5 + $0x18] sm:$0xff] }
 0x4ee   : > { %v396_v27 = vadd.f32 %v394_v60, %v393_v26 }
 0x4f0   : > { %v397_v28 = vmax.f32 %v396_v27, 0.0 }
 0x4f2   : > { %v425_v29 = vrot.slane %v397_v28, %v424_v1 }
 0x4f4   : > { %v426_v30 = vmul.f32 %v425_v29, %v348_v5  ;;  %v428_v31 = vmul.f32 %v425_v29, %v350_v15  ;;  %v427_v32 = vmul.f32 %v425_v29, %v349_v4  ;;  %v429_v33 = vmul.f32 %v425_v29, %v351_v17 }
 0x4f6   : > { %v431_v40 = vsel %vm430_vm2, %v426_v30, 0.0  ;;  %v437_v43 = vsel %vm430_vm2, %v428_v31, 0.0  ;;  %v434_v44 = vsel %vm430_vm2, %v427_v32, 0.0  ;;  %v440_v45 = vsel %vm430_vm2, %v429_v33, 0.0 }
 0x528   : > { %v460_v34 = vpop.permute.xlu1 %459  ;;  %v462_v35 = vpop.permute.xlu0 %461 }
 0x529   : > { %v471_v36 = vsel %vm430_vm2, %v460_v34, 0.0  ;;  %v474_v37 = vsel %vm430_vm2, %v462_v35, 0.0 }
 0x52a   : > { %472 = vadd.xlane.f32.xlu0 %v471_v36  ;;  %475 = vadd.xlane.f32.xlu1 %v474_v37 }
 0x52c   : > { %v464_v38 = vpop.permute.xlu1 %463 }
 0x52d   : > { %v477_v39 = vsel %vm430_vm2, %v464_v38, 0.0 }
 0x52e   : > { %478 = vadd.xlane.f32.xlu0 %v477_v39  ;;  %432 = vadd.xlane.f32.xlu1 %v431_v40 }
 0x530   : > { %v466_v41 = vpop.permute.xlu1 %465 }
 0x531   : > { %v480_v42 = vsel %vm430_vm2, %v466_v41, 0.0 }
 0x532   : > { %481 = vadd.xlane.f32.xlu0 %v480_v42  ;;  %438 = vadd.xlane.f32.xlu1 %v437_v43 }
 0x536   : > { %435 = vadd.xlane.f32.xlu0 %v434_v44 }
 0x53a   : > { %441 = vadd.xlane.f32.xlu0 %v440_v45 }
 0x5b7   : > { %v476_v49 = vpop.xlane.xlu1 %475  ;;  %v473_v50 = vpop.xlane.xlu0 %472 }
 0x5b8   : > { %v484_v51 = vadd.f32 %v476_v49, %v353_v47  ;;  %v483_v52 = vadd.f32 %v473_v50, %v352_v48 }
 0x5ba   : > { %v659_v53 = vmul.f32 -1.442695, %v484_v51  ;;  %v658_v54 = vmul.f32 -1.442695, %v483_v52 }
 0x5bb   : > { %v479_v55 = vpop.xlane.xlu0 %478  ;;  %v433_v13 = vpop.xlane.xlu1 %432 }
 0x5bc   : > { %731 = vpow2.f32 %v659_v53  ;;  %v485_v57 = vadd.f32 %v479_v55, %v354_v56  ;;  %v443_v14 = vadd.f32 %v433_v13, %v352_v48 }
 0x5bd   : > { %733 = vpow2.f32 %v658_v54 }
 0x5be   : > { %v660_v63 = vmul.f32 -1.442695, %v485_v57 }
 0x5bf   : > { %v482_v59 = vpop.xlane.xlu0 %481  ;;  %v439_v22 = vpop.xlane.xlu1 %438 }
 0x5c0   : > { %v486_v0 = vadd.f32 %v482_v59, %v355_v58  ;;  %v445_v23 = vadd.f32 %v439_v22, %v354_v56 }
 0x5c2   : > { %v661_v3 = vmul.f32 -1.442695, %v486_v0 }
 0x5c3   : > { %v436_v17 = vpop.xlane.xlu0 %435 }
 0x5c4   : > { %v444_v21 = vadd.f32 %v436_v17, %v353_v47 }
 0x5c6   : > { %v732_v60 = vpop.eup %731 }
 0x5c7   : > { %v734_v61 = vpop.eup %733  ;;  %v500_v62 = vadd.f32 1.0, %v732_v60  ;;  %v442_v26 = vpop.xlane.xlu0 %441 }
 0x5c8   : > { %v499_v1 = vadd.f32 1.0, %v734_v61  ;;  %v446_v27 = vadd.f32 %v442_v26, %v355_v58 }
 0x5c9   : > { %735 = vrcp.f32 %v500_v62 }
 0x5ca   : > { %737 = vrcp.f32 %v499_v1 }
 0x5cb   : > { %739 = vpow2.f32 %v660_v63 }
 0x5cc   : > { %741 = vpow2.f32 %v661_v3 }
 0x5d3   : > { %v736_v4 = vpop.eup %735 }
 0x5d4   : > { %v738_v5 = vpop.eup %737  ;;  %518 = vperm.xlu0 %716, %v736_v4  }
 0x5d5   : > { %v740_v6 = vpop.eup %739  ;;  %513 = vperm.xlu1 %715, %v738_v5  }
 0x5d6   : > { %v501_v15 = vadd.f32 1.0, %v740_v6  ;;  %v742_v16 = vpop.eup %741 }
 0x5d7   : > { %v502_v18 = vadd.f32 1.0, %v742_v16 }
 0x5d8   : > { %720 = vset.pattern.permute.xlu0 %v811_v2  ;;  %743 = vrcp.f32 %v501_v15 }
 0x5d9   : > { %717 = vset.pattern.permute.xlu1 %v811_v2  ;;  %745 = vrcp.f32 %v502_v18 }
 0x5da   : > { %541 = vperm.xlu1 %717, %v443_v14  }
 0x5de   : > { %546 = vperm.xlu1 %717, %v444_v21  }
 0x5e2   : > { %551 = vperm.xlu1 %717, %v445_v23   ;;  %v744_v24 = vpop.eup %743 }
 0x5e3   : > { %v746_v25 = vpop.eup %745 }
 0x5e6   : > { %718 = vset.pattern.permute.xlu1 %v813_v46 }
 0x5e7   : > { %523 = vperm.xlu1 %718, %v744_v24  }
 0x5eb   : > { %528 = vperm.xlu1 %718, %v746_v25  }
 0x5ef   : > { %719 = vset.pattern.permute.xlu1 %v811_v2 }
 0x5f0   : > { %556 = vperm.xlu1 %719, %v446_v27  }
 0x653   : > { %v519_v31 = vpop.permute.xlu0 %518 }
 0x654   : > { %v514_v28 = vpop.permute.xlu1 %513  ;;  %v533_v35 = vmul.f32 %v519_v31, %v923_v9  ;;  %v534_v36 = vmul.f32 %v519_v31, %v925_v10 }
 0x655   : > { %v531_v29 = vmul.f32 %v514_v28, %v919_v7  ;;  %v532_v30 = vmul.f32 %v514_v28, %v921_v8 }
 0x659   : > { %v542_v32 = vpop.permute.xlu1 %541 }
 0x65a   : > { %v559_v33 = vadd.f32 %v542_v32, %v531_v29  ;;  %v560_v34 = vadd.f32 %v542_v32, %v532_v30 }
 0x65c   : > { %567 = vst [vmem:[%s244_s26] sm:$0xff] %v559_v33  ;;  %568 = vst [vmem:[%s244_s26 + $0x8] sm:$0xff] %v560_v34 }
 0x65d   : > { %v547_v2 = vpop.permute.xlu1 %546 }
 0x65e   : > { %v561_v37 = vadd.f32 %v547_v2, %v533_v35  ;;  %v562_v38 = vadd.f32 %v547_v2, %v534_v36 }
 0x660   : > { %569 = vst [vmem:[%s244_s26 + $0x10] sm:$0xff] %v561_v37  ;;  %570 = vst [vmem:[%s244_s26 + $0x18] sm:$0xff] %v562_v38 }
 0x661   : > { %v552_v7 = vpop.permute.xlu1 %551 }
 0x666   : > { %v524_v39 = vpop.permute.xlu1 %523 }
 0x667   : > { %v535_v8 = vmul.f32 %v524_v39, %v927_v11  ;;  %v536_v40 = vmul.f32 %v524_v39, %v929_v12 }
 0x669   : > { %v563_v41 = vadd.f32 %v552_v7, %v535_v8  ;;  %v564_v9 = vadd.f32 %v552_v7, %v536_v40 }
 0x66a   : > { %v529_v42 = vpop.permute.xlu1 %528 }
 0x66b   : > { %571 = vst [vmem:[%s244_s26 + $0x20] sm:$0xff] %v563_v41  ;;  %572 = vst [vmem:[%s244_s26 + $0x28] sm:$0xff] %v564_v9  ;;  %v537_v10 = vmul.f32 %v529_v42, %v935_v19  ;;  %v538_v43 = vmul.f32 %v529_v42, %v937_v20 }
 0x66f   : > { %v557_v44 = vpop.permute.xlu1 %556 }
 0x670   : > { %v565_v11 = vadd.f32 %v557_v44, %v537_v10  ;;  %v566_v12 = vadd.f32 %v557_v44, %v538_v43 }
 0x672   : > { %573 = vst [vmem:[%s244_s26 + $0x30] sm:$0xff] %v565_v11  ;;  %574 = vst [vmem:[%s244_s26 + $0x38] sm:$0xff] %v566_v12 }
 0x673   : > { %760 = shalt.err (!%p757_p3)
}
 0x674   : > { %s761_s16 = scalar_lea.hbm %s1026_s11, 1024  ;;  %s765_s19 = scalar_lea.hbm %s1079_s6, 2048 }
 0x675   : > { %p762_p4 = scmp.ne.s32.totalorder %s1026_s11, %s761_s16  ;;  %p766_p9 = scmp.lt.u32.totalorder %s1026_s11, %s1079_s6 }
 0x676   : > { %p767_p10 = scmp.lt.u32.totalorder %s765_s19, %s761_s16  ;;  %p769_p12 = scmp.lt.u32.totalorder %s761_s16, %s1026_s11 }
 0x677   : > { %p763_p7 = pnand %p762_p4, %p890_p5 }
 0x678   : > { %p768_p11 = por %p767_p10, %p766_p9 }
 0x679   : > { %p764_p8 = pneg %p763_p7 }
 0x67a   : > { %p770_p13 = por %p769_p12, %p768_p11 }
 0x67c   : > { %p771_p0 = pnand %p770_p13, %p764_p8 }
 0x67e   : > { %774 = shalt.err (!%p771_p0)
}
 0x67f   : > { %s815_s28 = smov 256   ;;  %s816_s9 = smov 16  }
 0x680   : > { %669 = dma.vmem_to_hbm [thread:$0]  (%p890_p5), %s1028_s29, 1024, %s1026_s11, %s1032_s25, %s815_s28, %s815_s28, %s816_s9  }
 0x681 PF: > { %p675_p1 = scmp.ge.s32.totalorder %s809_s24, 2  ;;  %s604_s10 = sand.u32 1, %s797_s21  }
 0x682   : > { %s605_s12 = scalar_lea.sflag [#allocation3], %s604_s10 }
 0x683   : > { %p672_p2 = pnand %p675_p1, %p894_p6 }
 0x685   : > { %792 = dma.done.wait (!%p672_p2), %s605_s12, 1024  }
 0x686   : > { %794 = vsyncadd (!%p672_p2), %s605_s12, 4294966272  ;;  %p16_p3 = scmp.ge.s32.totalorder %s877_s27, 4   ;;  %s1082_s21 = smov %s801_s22 }
 0x687   : > { %s1083_s22 = smov %s805_s23  ;;  %s1084_s23 = smov %s888_s30 }
 0x688   : > { %s1085_s24 = smov %s877_s27  ;;  %18 = sbr.rel (!%p16_p3) target bundleno = 3 (0x3), region = 79 }
 0x68f   :  { %610 = vsyncpa [#allocation3], 1 }
 0x690   :  { %612 = vsyncpa [#allocation3 + $0x1], 1 }

</bundles_post_ra>
